<compile_context>
chip_gen: v5e
topology: v5e:2x2
jax: 0.10.0
libtpu: 0.0.40
codegen_flags: <defaults>
</compile_context>

<pallas_src>
import math
import functools

import jax
import jax.numpy as jnp
import numpy as np
from jax import lax
from jax.experimental import pallas as pl
from jax.experimental.pallas import tpu as pltpu

# ----------------------------- configuration ---------------------------------
CFG = dict(
    batch=2,
    time_win=8,
    seq_len=8,
    input_dim=16,        # features
    shallow_hidden=32,
    latent_dim=16,
    memory_dim=32,
    pred_hidden=32,
    output_dim=8,
    freeze_threshold=0.2,
)

# ------------------------------- Pallas kernel --------------------------------
def snn_memory_kernel(x_ref,
                      wsh_ref, bsh_ref,          # shallow SNN linear
                      wqkv_ref,                  # fused reducer + q/k/v projection [H, 3M]
                      wo_ref, bo_ref,            # memory output projection
                      w1s_ref, w1m_ref, b1_ref,  # predictor layer 1 (split weight)
                      w2_ref, b2_ref,            # predictor layer 2
                      pred_ref, mem_ref,
                      *, tn, seq_len, memory_dim, freeze_threshold):
    S, M = seq_len, memory_dim
    F = x_ref.shape[-1]
    x = x_ref[...].reshape(tn * S, F)                                   # [TN*S, F]

    # --- shallow SNN: linear + freeze-threshold spike gate ------------------
    h = jnp.dot(x, wsh_ref[...], preferred_element_type=jnp.float32) + bsh_ref[...]
    shallow = jnp.where(h > freeze_threshold, h, 0.0)                   # [TN*S, H]
    # TODO(synk): ShallowSNN's persistent membrane/LIF state is not defined in the
    # provided source; a stateless threshold gate is used per timestep.

    # --- fused reducer + q/k/v projection (single [H, 3M] matmul) -----------
    # (wqkv already contains wred@{wq*scale, wk, wv}, concatenated on the lane axis.)
    qkv = jnp.dot(shallow, wqkv_ref[...], preferred_element_type=jnp.float32)  # [TN*S, 3M]
    qkv3 = qkv.reshape(tn, S, 3 * M)
    q = qkv3[:, :, :M]
    k = qkv3[:, :, M:2 * M]
    v = qkv3[:, :, 2 * M:]

    # --- batched single-head self-attention over seq -------------------------
    # contract on the last axis of both operands: no explicit k transpose.
    scores = lax.dot_general(q, k, (((2,), (2,)), ((0,), (0,))),
                             preferred_element_type=jnp.float32)        # [TN, S, S]
    smax = jnp.max(scores, axis=-1, keepdims=True)
    p = jnp.exp(scores - smax)
    attn_w = p * pl.reciprocal(jnp.sum(p, axis=-1, keepdims=True), approx=True)
    attn = lax.dot_general(attn_w, v, (((2,), (1,)), ((0,), (0,))),
                           preferred_element_type=jnp.float32)          # [TN, S, M]

    pooled = jnp.mean(attn, axis=1)                                     # [TN, M]
    memory = jnp.tanh(
        jnp.dot(pooled, wo_ref[...], preferred_element_type=jnp.float32) + bo_ref[...]
    )                                                                    # [TN, M]

    # --- predictor head on [last shallow step || memory] (split-weight, no concat)
    last_shallow = shallow.reshape(tn, S, -1)[:, S - 1, :]               # [TN, H]
    hid = (jnp.dot(last_shallow, w1s_ref[...], preferred_element_type=jnp.float32)
           + jnp.dot(memory, w1m_ref[...], preferred_element_type=jnp.float32)
           + b1_ref[...])
    hid = jnp.maximum(hid, 0.0)                                          # [TN, P]
    # TODO(synk): Dropout is identity (inference path).
    pred = jnp.dot(hid, w2_ref[...], preferred_element_type=jnp.float32) + b2_ref[...]

    pred_ref[...] = pred                                                 # [TN, O]
    mem_ref[...] = memory                                                # [TN, M]


# ------------------------- parameter fusion (done once) ------------------------
def fuse_params(params, cfg):
    """Fold the reducer and softmax scale into the attention weights; split w1."""
    H, M = cfg["shallow_hidden"], cfg["memory_dim"]
    scale = 1.0 / math.sqrt(M)
    wqkv = jnp.concatenate(
        [params["wred"] @ params["wq"] * scale,
         params["wred"] @ params["wk"],
         params["wred"] @ params["wv"]], axis=1)                         # [H, 3M]
    return dict(
        wsh=params["wsh"], bsh=params["bsh"],
        wqkv=wqkv,
        wo=params["wo"], bo=params["bo"],
        w1s=params["w1"][:H, :], w1m=params["w1"][H:, :], b1=params["b1"],
        w2=params["w2"], b2=params["b2"],
    )


# ------------------------------- wrapper --------------------------------------
def _full_spec(shape):
    nd = len(shape)
    return pl.BlockSpec(shape, lambda n, _nd=nd: (0,) * _nd)


def snn_memory_forward(x, fused, cfg):
    """x: [batch, time_win, seq_len, features] -> (pred [B,T,O], memory [B,T,M])."""
    B, T, S, F = x.shape
    assert S == cfg["seq_len"] and F == cfg["input_dim"]
    N = B * T
    O, M = cfg["output_dim"], cfg["memory_dim"]

    xf = x.reshape(N, S, F)
    n_pad = ((N + 7) // 8) * 8                 # sublane-aligned row blocks
    if n_pad != N:
        xf = jnp.pad(xf, ((0, n_pad - N), (0, 0), (0, 0)))
    G = 2 if n_pad % 16 == 0 else 1            # grid divisible by 2 -> both v7x TCs
    TN = n_pad // G

    keys = ("wsh", "bsh", "wqkv", "wo", "bo", "w1s", "w1m", "b1", "w2", "b2")
    plist = [fused[k] for k in keys]

    kernel = functools.partial(
        snn_memory_kernel,
        tn=TN, seq_len=S, memory_dim=M, freeze_threshold=cfg["freeze_threshold"])

    in_specs = [pl.BlockSpec((TN, S, F), lambda n: (n, 0, 0))]
    in_specs += [_full_spec(p.shape) for p in plist]
    out_specs = [pl.BlockSpec((TN, O), lambda n: (n, 0)),
                 pl.BlockSpec((TN, M), lambda n: (n, 0))]
    out_shape = (jax.ShapeDtypeStruct((n_pad, O), jnp.float32),
                 jax.ShapeDtypeStruct((n_pad, M), jnp.float32))

    pred, mem = pl.pallas_call(
        kernel,
        grid=(G,),
        in_specs=in_specs,
        out_specs=out_specs,
        out_shape=out_shape,
        compiler_params=pltpu.CompilerParams(dimension_semantics=("parallel",)),
    )(xf, *plist)

    return pred[:N].reshape(B, T, O), mem[:N].reshape(B, T, M)


# --------------------------- pure-JAX reference --------------------------------
def reference_forward(x, params, cfg):
    B, T, S, F = x.shape
    N = B * T
    M = cfg["memory_dim"]
    xf = x.reshape(N, S, F)

    h = jnp.einsum("nsf,fh->nsh", xf, params["wsh"]) + params["bsh"]
    shallow = jnp.where(h > cfg["freeze_threshold"], h, 0.0)
    comp = jnp.einsum("nsh,hl->nsl", shallow, params["wred"])

    q = jnp.einsum("nsl,lm->nsm", comp, params["wq"])
    k = jnp.einsum("nsl,lm->nsm", comp, params["wk"])
    v = jnp.einsum("nsl,lm->nsm", comp, params["wv"])
    scores = jnp.einsum("nqm,nkm->nqk", q, k) / math.sqrt(M)
    attn_w = jax.nn.softmax(scores, axis=-1)
    attn = jnp.einsum("nqk,nkm->nqm", attn_w, v)
    pooled = jnp.mean(attn, axis=1)
    memory = jnp.tanh(pooled @ params["wo"] + params["bo"])

    last_shallow = shallow[:, -1, :]
    combined = jnp.concatenate([last_shallow, memory], axis=-1)
    hid = jnp.maximum(combined @ params["w1"] + params["b1"], 0.0)
    pred = hid @ params["w2"] + params["b2"]

    return (pred.reshape(B, T, cfg["output_dim"]),
            memory.reshape(B, T, M))


# ------------------------------- parameters -----------------------------------
def init_params(key, cfg):
    F, H = cfg["input_dim"], cfg["shallow_hidden"]
    L, M = cfg["latent_dim"], cfg["memory_dim"]
    P, O = cfg["pred_hidden"], cfg["output_dim"]
    ks = jax.random.split(key, 12)

    def w(k, shape):
        fan_in = shape[0]
        return (jax.random.normal(k, shape, jnp.float32) / math.sqrt(fan_in)).astype(jnp.float32)

    return dict(
        wsh=w(ks[0], (F, H)),  bsh=0.01 * jax.random.normal(ks[1], (1, H), jnp.float32),
        wred=w(ks[2], (H, L)),
        wq=w(ks[3], (L, M)),   wk=w(ks[4], (L, M)),   wv=w(ks[5], (L, M)),
        wo=w(ks[6], (M, M)),   bo=0.01 * jax.random.normal(ks[7], (1, M), jnp.float32),
        w1=w(ks[8], (H + M, P)), b1=0.01 * jax.random.normal(ks[9], (1, P), jnp.float32),
        w2=w(ks[10], (P, O)),  b2=0.01 * jax.random.normal(ks[11], (1, O), jnp.float32),
    )


# ---------------------------------- main ---------------------------------------
if __name__ == "__main__":
    key = jax.random.PRNGKey(0)
    k_x, k_p = jax.random.split(key)

    x = jax.random.normal(
        k_x, (CFG["batch"], CFG["time_win"], CFG["seq_len"], CFG["input_dim"]), jnp.float32)
    params = init_params(k_p, CFG)
    fused = fuse_params(params, CFG)          # weight algebra done once, outside the kernel

    pred, mem = snn_memory_forward(x, fused, CFG)
    jax.block_until_ready(pred)
    jax.block_until_ready(mem)

    pred_ref, mem_ref = reference_forward(x, params, CFG)
    # Tolerance loosened slightly vs. 1e-5: approx EUP reciprocal in the softmax and
    # fp reassociation from the weight folding.
    np.testing.assert_allclose(np.asarray(pred), np.asarray(pred_ref), rtol=5e-3, atol=5e-3)
    np.testing.assert_allclose(np.asarray(mem), np.asarray(mem_ref), rtol=5e-3, atol=5e-3)

    assert pred.shape == (CFG["batch"], CFG["time_win"], CFG["output_dim"])
    assert mem.shape == (CFG["batch"], CFG["time_win"], CFG["memory_dim"])
    print("KERNEL_OK")
</pallas_src>

<mosaic_0001>
module attributes {stable_mosaic.version = 11 : i64} {
  func.func @snn_memory_kernel(%arg0: i32, %arg1: memref<8x8x16xf32, #tpu.memory_space<vmem>>, %arg2: memref<16x32xf32, #tpu.memory_space<vmem>>, %arg3: memref<1x32xf32, #tpu.memory_space<vmem>>, %arg4: memref<32x96xf32, #tpu.memory_space<vmem>>, %arg5: memref<32x32xf32, #tpu.memory_space<vmem>>, %arg6: memref<1x32xf32, #tpu.memory_space<vmem>>, %arg7: memref<32x32xf32, #tpu.memory_space<vmem>>, %arg8: memref<32x32xf32, #tpu.memory_space<vmem>>, %arg9: memref<1x32xf32, #tpu.memory_space<vmem>>, %arg10: memref<32x8xf32, #tpu.memory_space<vmem>>, %arg11: memref<1x8xf32, #tpu.memory_space<vmem>>, %arg12: memref<8x8xf32, #tpu.memory_space<vmem>>, %arg13: memref<8x32xf32, #tpu.memory_space<vmem>>) attributes {dimension_semantics = [#tpu.dimension_semantics<parallel>], iteration_bounds = array<i64: 2>, scalar_prefetch = 0 : i64, scratch_operands = 0 : i64, tpu.core_type = #tpu.core_type<tc>, window_params = [{transform_indices = @transform_0, window_bounds = array<i64: 8, 8, 16>}, {pipeline_mode = #tpu.pipeline_mode<synchronous>, transform_indices = @transform_1, window_bounds = array<i64: 16, 32>}, {pipeline_mode = #tpu.pipeline_mode<synchronous>, transform_indices = @transform_2, window_bounds = array<i64: 1, 32>}, {pipeline_mode = #tpu.pipeline_mode<synchronous>, transform_indices = @transform_3, window_bounds = array<i64: 32, 96>}, {pipeline_mode = #tpu.pipeline_mode<synchronous>, transform_indices = @transform_4, window_bounds = array<i64: 32, 32>}, {pipeline_mode = #tpu.pipeline_mode<synchronous>, transform_indices = @transform_5, window_bounds = array<i64: 1, 32>}, {pipeline_mode = #tpu.pipeline_mode<synchronous>, transform_indices = @transform_6, window_bounds = array<i64: 32, 32>}, {pipeline_mode = #tpu.pipeline_mode<synchronous>, transform_indices = @transform_7, window_bounds = array<i64: 32, 32>}, {pipeline_mode = #tpu.pipeline_mode<synchronous>, transform_indices = @transform_8, window_bounds = array<i64: 1, 32>}, {pipeline_mode = #tpu.pipeline_mode<synchronous>, transform_indices = @transform_9, window_bounds = array<i64: 32, 8>}, {pipeline_mode = #tpu.pipeline_mode<synchronous>, transform_indices = @transform_10, window_bounds = array<i64: 1, 8>}, {transform_indices = @transform_11, window_bounds = array<i64: 8, 8>}, {transform_indices = @transform_12, window_bounds = array<i64: 8, 32>}]} {
    %c0 = arith.constant 0 : index
    %c0_0 = arith.constant 0 : index
    %c0_1 = arith.constant 0 : index
    %0 = vector.load %arg1[%c0, %c0_0, %c0_1] : memref<8x8x16xf32, #tpu.memory_space<vmem>>, vector<8x8x16xf32>
    %1 = vector.shape_cast %0 : vector<8x8x16xf32> to vector<64x16xf32>
    %c0_2 = arith.constant 0 : index
    %c0_3 = arith.constant 0 : index
    %2 = vector.load %arg2[%c0_2, %c0_3] : memref<16x32xf32, #tpu.memory_space<vmem>>, vector<16x32xf32>
    %cst = arith.constant dense<0.000000e+00> : vector<64x32xf32>
    %3 = tpu.matmul %1, %2, %cst {dimension_numbers = #tpu.dot_dimension_numbers<[1], [0], [0], [1], [0, 0, 1, 1], [], []>} : vector<64x16xf32>, vector<16x32xf32>, vector<64x32xf32> -> vector<64x32xf32>
    %c0_4 = arith.constant 0 : index
    %c0_5 = arith.constant 0 : index
    %4 = vector.load %arg3[%c0_4, %c0_5] : memref<1x32xf32, #tpu.memory_space<vmem>>, vector<1x32xf32>
    %5 = vector.broadcast %4 : vector<1x32xf32> to vector<64x32xf32>
    %6 = arith.addf %3, %5 : vector<64x32xf32>
    %cst_6 = arith.constant 2.000000e-01 : f32
    %7 = vector.broadcast %cst_6 : f32 to vector<64x32xf32>
    %8 = arith.cmpf ogt, %6, %7 : vector<64x32xf32>
    %cst_7 = arith.constant 0.000000e+00 : f32
    %9 = vector.broadcast %cst_7 : f32 to vector<64x32xf32>
    %10 = arith.select %8, %6, %9 : vector<64x32xi1>, vector<64x32xf32>
    %c0_8 = arith.constant 0 : index
    %c0_9 = arith.constant 0 : index
    %11 = vector.load %arg4[%c0_8, %c0_9] : memref<32x96xf32, #tpu.memory_space<vmem>>, vector<32x96xf32>
    %cst_10 = arith.constant dense<0.000000e+00> : vector<64x96xf32>
    %12 = tpu.matmul %10, %11, %cst_10 {dimension_numbers = #tpu.dot_dimension_numbers<[1], [0], [0], [1], [0, 0, 1, 1], [], []>} : vector<64x32xf32>, vector<32x96xf32>, vector<64x96xf32> -> vector<64x96xf32>
    %13 = vector.shape_cast %12 : vector<64x96xf32> to vector<8x8x96xf32>
    %14 = vector.extract_strided_slice %13 {offsets = [0, 0, 0], sizes = [8, 8, 32], strides = [1, 1, 1]} : vector<8x8x96xf32> to vector<8x8x32xf32>
    %15 = vector.extract_strided_slice %13 {offsets = [0, 0, 32], sizes = [8, 8, 32], strides = [1, 1, 1]} : vector<8x8x96xf32> to vector<8x8x32xf32>
    %16 = vector.extract_strided_slice %13 {offsets = [0, 0, 64], sizes = [8, 8, 32], strides = [1, 1, 1]} : vector<8x8x96xf32> to vector<8x8x32xf32>
    %cst_11 = arith.constant dense<0.000000e+00> : vector<8x8x8xf32>
    %17 = tpu.matmul %14, %15, %cst_11 {dimension_numbers = #tpu.dot_dimension_numbers<[2], [2], [1], [1], [0, 0, 0, 1, 1, 1], [0], [0]>} : vector<8x8x32xf32>, vector<8x8x32xf32>, vector<8x8x8xf32> -> vector<8x8x8xf32>
    %cst_12 = arith.constant dense<0xFF800000> : vector<8x8xf32>
    %18 = vector.multi_reduction <maximumf>, %17, %cst_12 [2] : vector<8x8x8xf32> to vector<8x8xf32>
    %19 = vector.shape_cast %18 : vector<8x8xf32> to vector<8x8x1xf32>
    %20 = vector.broadcast %19 : vector<8x8x1xf32> to vector<8x8x8xf32>
    %21 = arith.subf %17, %20 : vector<8x8x8xf32>
    %22 = math.exp %21 : vector<8x8x8xf32>
    %cst_13 = arith.constant dense<0.000000e+00> : vector<8x8xf32>
    %23 = vector.multi_reduction <add>, %22, %cst_13 [2] : vector<8x8x8xf32> to vector<8x8xf32>
    %24 = vector.shape_cast %23 : vector<8x8xf32> to vector<8x8x1xf32>
    %25 = tpu.reciprocal %24 {approx = true} : vector<8x8x1xf32> -> vector<8x8x1xf32>
    %26 = vector.broadcast %25 : vector<8x8x1xf32> to vector<8x8x8xf32>
    %27 = arith.mulf %22, %26 : vector<8x8x8xf32>
    %cst_14 = arith.constant dense<0.000000e+00> : vector<8x8x32xf32>
    %28 = tpu.matmul %27, %16, %cst_14 {dimension_numbers = #tpu.dot_dimension_numbers<[2], [1], [1], [2], [0, 0, 0, 1, 1, 2], [0], [0]>} : vector<8x8x8xf32>, vector<8x8x32xf32>, vector<8x8x32xf32> -> vector<8x8x32xf32>
    %cst_15 = arith.constant dense<0.000000e+00> : vector<8x32xf32>
    %29 = vector.multi_reduction <add>, %28, %cst_15 [1] : vector<8x8x32xf32> to vector<8x32xf32>
    %cst_16 = arith.constant 8.000000e+00 : f32
    %30 = vector.broadcast %cst_16 : f32 to vector<8x32xf32>
    %31 = arith.divf %29, %30 : vector<8x32xf32>
    %c0_17 = arith.constant 0 : index
    %c0_18 = arith.constant 0 : index
    %32 = vector.load %arg5[%c0_17, %c0_18] : memref<32x32xf32, #tpu.memory_space<vmem>>, vector<32x32xf32>
    %cst_19 = arith.constant dense<0.000000e+00> : vector<8x32xf32>
    %33 = tpu.matmul %31, %32, %cst_19 {dimension_numbers = #tpu.dot_dimension_numbers<[1], [0], [0], [1], [0, 0, 1, 1], [], []>} : vector<8x32xf32>, vector<32x32xf32>, vector<8x32xf32> -> vector<8x32xf32>
    %c0_20 = arith.constant 0 : index
    %c0_21 = arith.constant 0 : index
    %34 = vector.load %arg6[%c0_20, %c0_21] : memref<1x32xf32, #tpu.memory_space<vmem>>, vector<1x32xf32>
    %35 = vector.broadcast %34 : vector<1x32xf32> to vector<8x32xf32>
    %36 = arith.addf %33, %35 : vector<8x32xf32>
    %37 = math.tanh %36 : vector<8x32xf32>
    %38 = vector.shape_cast %10 : vector<64x32xf32> to vector<8x8x32xf32>
    %39 = vector.extract_strided_slice %38 {offsets = [0, 7, 0], sizes = [8, 1, 32], strides = [1, 1, 1]} : vector<8x8x32xf32> to vector<8x1x32xf32>
    %40 = vector.shape_cast %39 : vector<8x1x32xf32> to vector<8x32xf32>
    %c0_22 = arith.constant 0 : index
    %c0_23 = arith.constant 0 : index
    %41 = vector.load %arg7[%c0_22, %c0_23] : memref<32x32xf32, #tpu.memory_space<vmem>>, vector<32x32xf32>
    %cst_24 = arith.constant dense<0.000000e+00> : vector<8x32xf32>
    %42 = tpu.matmul %40, %41, %cst_24 {dimension_numbers = #tpu.dot_dimension_numbers<[1], [0], [0], [1], [0, 0, 1, 1], [], []>} : vector<8x32xf32>, vector<32x32xf32>, vector<8x32xf32> -> vector<8x32xf32>
    %c0_25 = arith.constant 0 : index
    %c0_26 = arith.constant 0 : index
    %43 = vector.load %arg8[%c0_25, %c0_26] : memref<32x32xf32, #tpu.memory_space<vmem>>, vector<32x32xf32>
    %cst_27 = arith.constant dense<0.000000e+00> : vector<8x32xf32>
    %44 = tpu.matmul %37, %43, %cst_27 {dimension_numbers = #tpu.dot_dimension_numbers<[1], [0], [0], [1], [0, 0, 1, 1], [], []>} : vector<8x32xf32>, vector<32x32xf32>, vector<8x32xf32> -> vector<8x32xf32>
    %45 = arith.addf %42, %44 : vector<8x32xf32>
    %c0_28 = arith.constant 0 : index
    %c0_29 = arith.constant 0 : index
    %46 = vector.load %arg9[%c0_28, %c0_29] : memref<1x32xf32, #tpu.memory_space<vmem>>, vector<1x32xf32>
    %47 = vector.broadcast %46 : vector<1x32xf32> to vector<8x32xf32>
    %48 = arith.addf %45, %47 : vector<8x32xf32>
    %cst_30 = arith.constant 0.000000e+00 : f32
    %49 = vector.broadcast %cst_30 : f32 to vector<8x32xf32>
    %50 = arith.maximumf %48, %49 : vector<8x32xf32>
    %c0_31 = arith.constant 0 : index
    %c0_32 = arith.constant 0 : index
    %51 = vector.load %arg10[%c0_31, %c0_32] : memref<32x8xf32, #tpu.memory_space<vmem>>, vector<32x8xf32>
    %cst_33 = arith.constant dense<0.000000e+00> : vector<8x8xf32>
    %52 = tpu.matmul %50, %51, %cst_33 {dimension_numbers = #tpu.dot_dimension_numbers<[1], [0], [0], [1], [0, 0, 1, 1], [], []>} : vector<8x32xf32>, vector<32x8xf32>, vector<8x8xf32> -> vector<8x8xf32>
    %c0_34 = arith.constant 0 : index
    %c0_35 = arith.constant 0 : index
    %53 = vector.load %arg11[%c0_34, %c0_35] : memref<1x8xf32, #tpu.memory_space<vmem>>, vector<1x8xf32>
    %54 = vector.broadcast %53 : vector<1x8xf32> to vector<8x8xf32>
    %55 = arith.addf %52, %54 : vector<8x8xf32>
    %c0_36 = arith.constant 0 : index
    %c0_37 = arith.constant 0 : index
    %56 = vector.load %arg12[%c0_36, %c0_37] : memref<8x8xf32, #tpu.memory_space<vmem>>, vector<8x8xf32>
    tpu.vector_store %arg12[%c0_36, %c0_37], %55 {strides = array<i32>} : memref<8x8xf32, #tpu.memory_space<vmem>>, vector<8x8xf32>,
    %c0_38 = arith.constant 0 : index
    %c0_39 = arith.constant 0 : index
    %57 = vector.load %arg13[%c0_38, %c0_39] : memref<8x32xf32, #tpu.memory_space<vmem>>, vector<8x32xf32>
    tpu.vector_store %arg13[%c0_38, %c0_39], %37 {strides = array<i32>} : memref<8x32xf32, #tpu.memory_space<vmem>>, vector<8x32xf32>,
    return
  }
  func.func @transform_0(%arg0: i32) -> (i32, i32, i32) {
    %c0_i32 = arith.constant 0 : i32
    %c0_i32_0 = arith.constant 0 : i32
    %c0_i32_1 = arith.constant 0 : i32
    return %arg0, %c0_i32, %c0_i32_0 : i32, i32, i32
  }
  func.func @transform_1(%arg0: i32) -> (i32, i32) {
    %c0_i32 = arith.constant 0 : i32
    %c0_i32_0 = arith.constant 0 : i32
    %c0_i32_1 = arith.constant 0 : i32
    return %c0_i32, %c0_i32_0 : i32, i32
  }
  func.func @transform_2(%arg0: i32) -> (i32, i32) {
    %c0_i32 = arith.constant 0 : i32
    %c0_i32_0 = arith.constant 0 : i32
    %c0_i32_1 = arith.constant 0 : i32
    return %c0_i32, %c0_i32_0 : i32, i32
  }
  func.func @transform_3(%arg0: i32) -> (i32, i32) {
    %c0_i32 = arith.constant 0 : i32
    %c0_i32_0 = arith.constant 0 : i32
    %c0_i32_1 = arith.constant 0 : i32
    return %c0_i32, %c0_i32_0 : i32, i32
  }
  func.func @transform_4(%arg0: i32) -> (i32, i32) {
    %c0_i32 = arith.constant 0 : i32
    %c0_i32_0 = arith.constant 0 : i32
    %c0_i32_1 = arith.constant 0 : i32
    return %c0_i32, %c0_i32_0 : i32, i32
  }
  func.func @transform_5(%arg0: i32) -> (i32, i32) {
    %c0_i32 = arith.constant 0 : i32
    %c0_i32_0 = arith.constant 0 : i32
    %c0_i32_1 = arith.constant 0 : i32
    return %c0_i32, %c0_i32_0 : i32, i32
  }
  func.func @transform_6(%arg0: i32) -> (i32, i32) {
    %c0_i32 = arith.constant 0 : i32
    %c0_i32_0 = arith.constant 0 : i32
    %c0_i32_1 = arith.constant 0 : i32
    return %c0_i32, %c0_i32_0 : i32, i32
  }
  func.func @transform_7(%arg0: i32) -> (i32, i32) {
    %c0_i32 = arith.constant 0 : i32
    %c0_i32_0 = arith.constant 0 : i32
    %c0_i32_1 = arith.constant 0 : i32
    return %c0_i32, %c0_i32_0 : i32, i32
  }
  func.func @transform_8(%arg0: i32) -> (i32, i32) {
    %c0_i32 = arith.constant 0 : i32
    %c0_i32_0 = arith.constant 0 : i32
    %c0_i32_1 = arith.constant 0 : i32
    return %c0_i32, %c0_i32_0 : i32, i32
  }
  func.func @transform_9(%arg0: i32) -> (i32, i32) {
    %c0_i32 = arith.constant 0 : i32
    %c0_i32_0 = arith.constant 0 : i32
    %c0_i32_1 = arith.constant 0 : i32
    return %c0_i32, %c0_i32_0 : i32, i32
  }
  func.func @transform_10(%arg0: i32) -> (i32, i32) {
    %c0_i32 = arith.constant 0 : i32
    %c0_i32_0 = arith.constant 0 : i32
    %c0_i32_1 = arith.constant 0 : i32
    return %c0_i32, %c0_i32_0 : i32, i32
  }
  func.func @transform_11(%arg0: i32) -> (i32, i32) {
    %c0_i32 = arith.constant 0 : i32
    %c0_i32_0 = arith.constant 0 : i32
    return %arg0, %c0_i32 : i32, i32
  }
  func.func @transform_12(%arg0: i32) -> (i32, i32) {
    %c0_i32 = arith.constant 0 : i32
    %c0_i32_0 = arith.constant 0 : i32
    return %arg0, %c0_i32 : i32, i32
  }
}

</mosaic_0001>

<bundles_post_ra>
// kernel: tpu_custom_call.1
= control target key start
LH: loop header
LB: loop body
LE: loop exit
PB: predicated region body
PF: predicated region fallthrough
CT: control target
= control target key end

     0   :  { %s2470_s0 = inlined_call_operand.hbm [shape: f32[16,8,16], index: 0, kind: input, shape index: {}]   ;;  %s2471_s1 = inlined_call_operand.hbm [shape: f32[16,32], index: 1, kind: input, shape index: {}]   ;;  %s2472_s2 = inlined_call_operand.vmem [shape: f32[1,32], index: 2, kind: input, shape index: {}]   ;;  %s2473_s3 = inlined_call_operand.vmem [shape: f32[32,96], index: 3, kind: input, shape index: {}]   ;;  %s2474_s4 = inlined_call_operand.hbm [shape: f32[32,32], index: 4, kind: input, shape index: {}]   ;;  %s2475_s5 = inlined_call_operand.vmem [shape: f32[1,32], index: 5, kind: input, shape index: {}]   ;;  %s2476_s6 = inlined_call_operand.hbm [shape: f32[32,32], index: 6, kind: input, shape index: {}]   ;;  %s2477_s7 = inlined_call_operand.hbm [shape: f32[32,32], index: 7, kind: input, shape index: {}]   ;;  %s2478_s8 = inlined_call_operand.vmem [shape: f32[1,32], index: 8, kind: input, shape index: {}]   ;;  %s2479_s9 = inlined_call_operand.vmem [shape: f32[32,8], index: 9, kind: input, shape index: {}]   ;;  %s2480_s10 = inlined_call_operand.vmem [shape: f32[1,8], index: 10, kind: input, shape index: {}]   ;;  %s2481_s11 = inlined_call_operand.vmem [shape: f32[16,8], index: 11, kind: output, shape index: {0}]   ;;  %s2482_s12 = inlined_call_operand.hbm [shape: f32[16,32], index: 12, kind: output, shape index: {1}]  }
   0x1   :  { %2487 = sst [smem:[#allocation18_spill]] %s2471_s1 }
   0x2   :  { %2488 = sst [smem:[#allocation19_spill]] %s2474_s4 }
   0x3   :  { %2489 = sst [smem:[#allocation20_spill]] %s2476_s6 }
   0x4   :  { %2490 = sst [smem:[#allocation21_spill]] %s2477_s7 }
   0x5   :  { %18 = vsyncpa [#allocation3], 0 }
   0x6   :  { %20 = vsyncpa [#allocation3 + $0x1], 0 }
   0x7   :  { %21 = vsyncpa [#allocation6], 0 }
   0x8   :  { %22 = vsyncpa [#allocation9], 0 }
   0x9   :  { %23 = vsyncpa [#allocation4], 0 }
   0xa   :  { %25 = vsyncpa [#allocation4 + $0x1], 0  ;;  %s2095_s21 = smov 0   ;;  %s2097_s22 = smov 0  }
   0xb   :  { %s2099_s23 = smov 0   ;;  %s2101_s24 = smov 0  }
   0xc LB: > { %2491 = sst [smem:[#allocation16_spill]] %s2007_s21  ;;  %s2116_s25 = sadd.s32 4294967295, %s2019_s24   ;;  %s2019_s24 = sphi %s2101_s24, %s2511_s24   ;;  %s2015_s23 = sphi %s2099_s23, %s2510_s23   ;;  %s2011_s22 = sphi %s2097_s22, %s2509_s22   ;;  %s2007_s21 = sphi %s2095_s21, %s2508_s21  }
   0xd   : > { %s1576_s26 = sadd.s32 4294967294, %s2019_s24   ;;  %p51_p0 = scmp.ne.s32.totalorder %s2011_s22, %s2007_s21 }
   0xe   : > { %p52_p1 = scmp.eq.s32.totalorder %s2116_s25, 0  ;;  %p311_p2 = scmp.eq.s32.totalorder %s2116_s25, 1 }
   0xf   : > { %p317_p3 = scmp.eq.s32.totalorder %s1576_s26, 1  ;;  %p1577_p5 = scmp.ge.s32.totalorder %s2019_s24, 1 }
  0x10   : > { %p2125_p4 = por %p52_p1, %p51_p0  ;;  %p324_p7 = scmp.lt.s32.totalorder %s2019_s24, 3 }
  0x11   : > { %p2130_p6 = por %p317_p3, %p51_p0  ;;  %s2495_s1 = sld [smem:[#allocation18_spill]] }
  0x12   : > { %p2138_p8 = pnand %p1577_p5, %p324_p7  ;;  %s2021_s15 = smov [#allocation5]  }
  0x13   : > { %s2493_s28 = scalar_select %p2130_p6, 1, 0 }
  0x14   : > { %p1663_p9 = pneg %p2138_p8  ;;  %s337_s16 = sshll.u32 %s2021_s15, 4  ;;  %s338_s16 = int_to_ptr.vmem [resolvable:$true] %s337_s16 }
  0x15   : > { %2494 = sst [smem:[#allocation17_spill]] %s2493_s28  ;;  %s2485_s26 = smov 128  }
  0x16   : > { %p2146_p10 = pnand %p1663_p9, %p52_p1  ;;  %s2498_s6 = sld [smem:[#allocation20_spill]] }
  0x17   : > { %s335_s13 = sshll.u32 %s2495_s1, 4  ;;  %s2486_s29 = smov 8   ;;  %s336_s13 = int_to_ptr.hbm [resolvable:$true] %s335_s13 }
  0x18   : > { %1666 = dma.hbm_to_vmem [thread:$0]  (!%p2146_p10), %s336_s13, 256, %s338_s16, [#allocation6], %s2485_s26, %s2485_s26, %s2486_s29  }
  0x19   : > { %s2024_s30 = smov [#allocation8]   ;;  %s2499_s4 = sld [smem:[#allocation19_spill]] }
  0x1a   : > { %s374_s15 = sshll.u32 %s2024_s30, 4  ;;  %s2500_s7 = sld [smem:[#allocation21_spill]]  ;;  %s375_s15 = int_to_ptr.vmem [resolvable:$true] %s374_s15 }
  0x1b   : > { %s2025_s19 = smov [#allocation7]   ;;  %s2026_s28 = smov [#allocation10]  }
  0x1c   : > { %s372_s20 = sshll.u32 %s2498_s6, 4  ;;  %s357_s1 = sshll.u32 %s2025_s19, 4  ;;  %s373_s20 = int_to_ptr.hbm [resolvable:$true] %s372_s20  ;;  %s358_s1 = int_to_ptr.vmem [resolvable:$true] %s357_s1 }
  0x1d   : > { %1672 = dma.hbm_to_vmem [thread:$0]  (!%p2146_p10), %s373_s20, 512, %s375_s15, [#allocation9], %s2485_s26, %s2485_s26, %s2486_s29  }
  0x1e   : > { %s388_s20 = sshll.u32 %s2026_s28, 4  ;;  %s2181_s30 = sadd.s32 1, %s2019_s24   ;;  %s389_s20 = int_to_ptr.vmem [resolvable:$true] %s388_s20 }
  0x1f   : > { %s355_s21 = sshll.u32 %s2499_s4, 4  ;;  %s38_s15 = sadd.s32 1, %s2015_s23  ;;  %s356_s21 = int_to_ptr.hbm [resolvable:$true] %s355_s21 }
  0x20   : > { %s386_s18 = sshll.u32 %s2500_s7, 4  ;;  %s35_s13 = ssub.s32 %s2019_s24, %s2181_s30  ;;  %s387_s18 = int_to_ptr.hbm [resolvable:$true] %s386_s18 }
  0x21   : > { %1669 = dma.hbm_to_vmem [thread:$0]  (!%p2146_p10), %s356_s21, 512, %s358_s1, [#allocation6], %s2485_s26, %s2485_s26, %s2486_s29  }
  0x22   : > { %1675 = dma.hbm_to_vmem [thread:$0]  (!%p2146_p10), %s387_s18, 512, %s389_s20, [#allocation9], %s2485_s26, %s2485_s26, %s2486_s29  }
  0x23   : > { %p45_p12 = scmp.ne.s32.totalorder %s2015_s23, %s2011_s22  ;;  %p36_p13 = scmp.eq.s32.totalorder %s35_s13, 0 }
  0x24   : > { %p46_p0 = scmp.eq.s32.totalorder %s2019_s24, 0  ;;  %p1688_p5 = scmp.lt.s32.totalorder %s2019_s24, 2 }
  0x25   : > { %p2191_p3 = por %p311_p2, %p45_p12  ;;  %s411_s17 = sand.u32 1, %s2015_s23  }
  0x26   : > { %s2197_s16 = scalar_select %p36_p13, %s2015_s23, %s38_s15  }
  0x27   : > { %p47_p7 = por %p46_p0, %p45_p12  ;;  %s1583_s19 = sshll.u32 %s411_s17, 6 }
  0x28   : > { %s1642_s18 = sshll.u32 %s2019_s24, 6  ;;  %s415_s26 = scalar_lea.vmem [#allocation2], %s1583_s19 }
  0x29   : > { %s420_s20 = scalar_lea.hbm %s2470_s0, %s1642_s18  ;;  %s423_s29 = sshll.u32 %s415_s26, 4  ;;  %s424_s29 = int_to_ptr.vmem [resolvable:$true] %s423_s29 }
  0x2a   : > { %s421_s13 = sshll.u32 %s420_s20, 4  ;;  %p2204_p2 = pnand %p1688_p5, %p47_p7  ;;  %s422_s13 = int_to_ptr.hbm [resolvable:$true] %s421_s13 }
  0x2b   : > { %s412_s15 = scalar_lea.sflag [#allocation3], %s411_s17  ;;  %s1915_s6 = sshra.s32 %s422_s13, 4  ;;  %s1916_s6 = int_to_ptr.hbm [resolvable:$true] %s1915_s6 }
  0x2c   : > { %s1917_s7 = scalar_lea.hbm %s1916_s6, 64  ;;  %p1919_p10 = pneg %p2204_p2 }
  0x2d   : > { %p1918_p9 = scmp.ne.s32.totalorder %s1916_s6, %s1917_s7  ;;  %s1922_s26 = scalar_lea.hbm %s2470_s0, 128 }
  0x2e   : > { %p1923_p0 = scmp.lt.s32.totalorder %s1916_s6, %s2470_s0  ;;  %p1924_p5 = scmp.lt.s32.totalorder %s1922_s26, %s1917_s7 }
  0x2f   : > { %p1920_p12 = pnand %p1919_p10, %p1918_p9 }
  0x30   : > { %p1925_p7 = por %p1924_p5, %p1923_p0 }
  0x31   : > { %p1921_p13 = pneg %p1920_p12 }
  0x33   : > { %p1926_p11 = pnand %p1925_p7, %p1921_p13 }
  0x35   : > { %1929 = shalt.err (!%p1926_p11)
}
  0x36   : > { %s2503_s17 = smov 8   ;;  %s2504_s20 = smov 128  }
  0x37   : > { %1679 = dma.hbm_to_vmem [thread:$0]  (!%p2204_p2), %s422_s13, 1024, %s424_s29, %s412_s15, %s2504_s20, %s2504_s20, %s2503_s17  }
  0x38   : > { %435 = sbr.rel (%p2138_p8) target bundleno = 1450 (0x5aa), region = 64  ;;  %s2224_s18 = sand.u32 (!%p2138_p8), 1, %s2011_s22  }
  0x39   : > { %s1587_s6 = sshll.u32 (!%p2138_p8), %s2224_s18, 6  ;;  %s438_s7 = scalar_lea.sflag (!%p2138_p8), [#allocation3], %s2224_s18 }
  0x3a   : > { %s441_s19 = scalar_lea.vmem (!%p2138_p8), [#allocation2], %s1587_s6 }
  0x3d   : > { %1990 = dma.done.wait (%p2125_p4), %s438_s7, 1024  }
  0x3e   : > { %1992 = vsyncadd (%p2125_p4), %s438_s7, 4294966272 }
  0x3f   : > { %1994 = dma.done.wait (%p52_p1), [#allocation6], 768  }
  0x40   : > { %1996 = vsyncadd (%p52_p1), [#allocation6], 4294966528 }
  0x41   : > { %1998 = dma.done.wait (%p52_p1), [#allocation9], 1024  }
  0x42   : > { %2000 = vsyncadd (%p52_p1), [#allocation9], 4294966272  ;;  %v521_v0 = vld [vmem:[#allocation5 + $0x8] sm:$0xff]  ;;  %v520_v1 = vld [vmem:[#allocation5] sm:$0xff]  ;;  %vm526_vm0 = vcmask 130048   ;;  %vm612_vm1 = vcmask 261120  }
  0x43   : > { %565 = vmatpush.msra.mxu0 %v521_v0  ;;  %v512_v2 = vld [vmem:[%s441_s19] sm:$0xff]  ;;  %v513_v3 = vld [vmem:[%s441_s19 + $0x8] sm:$0xff]  ;;  %v514_v4 = vld [vmem:[%s441_s19 + $0x10] sm:$0xff]  ;;  %vm1278_vm4 = vcmask 1041409   ;;  %vm1280_vm6 = vcmask 1042434   ;;  %vm1282_vm8 = vcmask 1043459  }
  0x44   : > { %v515_v5 = vld [vmem:[%s441_s19 + $0x18] sm:$0xff]  ;;  %v516_v7 = vld [vmem:[%s441_s19 + $0x20] sm:$0xff]  ;;  %v517_v8 = vld [vmem:[%s441_s19 + $0x28] sm:$0xff]  ;;  %vm1284_vm10 = vcmask 1044484   ;;  %vm1286_vm12 = vcmask 1045509   ;;  %vm1288_vm14 = vcmask 1046534  }
  0x45   : > { %566 = vmatpush.msra.mxu0 %v520_v1  ;;  %v611_v6 = vld [vmem:[%s2473_s3 + $0x18] sm:$0xff]  ;;  %v518_v9 = vld [vmem:[%s441_s19 + $0x30] sm:$0xff]  ;;  %v609_v12 = vld [vmem:[%s2473_s3 + $0x8] sm:$0xff]  ;;  %vm1290_vm15 = vcmask 1047559   ;;  %s2027_s20 = smov 96   ;;  %s2028_s6 = smov 64  }
  0x46   : > { %1594 = vmatmul.msk.f32.vlgmr.msra.gmra.mxu0 %vm526_vm0, %v512_v2  ;;  %649 = vmatpush.msra.mxu1 %v611_v6  ;;  %v519_v10 = vld [vmem:[%s441_s19 + $0x38] sm:$0xff]  ;;  %v610_v11 = vld [vmem:[%s2473_s3 + $0x10] sm:$0xff]  ;;  %v608_v13 = vld [vmem:[%s2473_s3] sm:$0xff]  ;;  %s1592_s28 = sshll.u32 %s2224_s18, 3  ;;  %s1639_s7 = sshll.u32 %s2116_s25, 3 }
  0x47   : > { %v1755_v14 = vld [vmem:[%s2472_s2] ss:$0 sm:$0xff]  ;;  %s506_s17 = scalar_lea.vmem [#allocation11], %s1592_s28  ;;  %s1439_s27 = scalar_lea.hbm %s2482_s12, %s1639_s7 }
  0x48   : > { %650 = vmatpush.msra.mxu1 %v610_v11  ;;  %s1441_s14 = sshll.u32 %s506_s17, 4  ;;  %s1443_s29 = sshll.u32 %s1439_s27, 4  ;;  %s1442_s14 = int_to_ptr.vmem [resolvable:$true] %s1441_s14  ;;  %s1444_s29 = int_to_ptr.hbm [resolvable:$true] %s1443_s29 }
  0x49   : > { %s1426_s13 = scalar_lea.sflag [#allocation4], %s2224_s18  ;;  %s1959_s15 = sshra.s32 %s1444_s29, 4  ;;  %s1960_s15 = int_to_ptr.hbm [resolvable:$true] %s1959_s15 }
  0x4a   : > { %651 = vmatpush.msra.mxu1 %v609_v12  ;;  %s1961_s26 = scalar_lea.hbm %s1960_s15, 8  ;;  %p1966_p11 = scmp.lt.s32.totalorder %s1960_s15, %s2482_s12 }
  0x4b   : > { %p1962_p1 = scmp.ne.s32.totalorder %s1960_s15, %s1961_s26 }
  0x4c   : > { %652 = vmatpush.msra.mxu1 %v608_v13 }
  0x4d   : > { %p1963_p4 = pnand %p1962_p1, %p2191_p3 }
  0x4e   : > { %1595 = vmatmul.msk.f32.gmra.mxu0 %vm526_vm0, %v513_v3 }
  0x4f   : > { %p1964_p8 = pneg %p1963_p4 }
  0x56   : > { %1596 = vmatmul.msk.f32.gmra.mxu0 %vm526_vm0, %v514_v4 }
  0x5e   : > { %1597 = vmatmul.msk.f32.gmra.mxu0 %vm526_vm0, %v515_v5 }
  0x66   : > { %1598 = vmatmul.msk.f32.gmra.mxu0 %vm526_vm0, %v516_v7 }
  0x6e   : > { %1599 = vmatmul.msk.f32.gmra.mxu0 %vm526_vm0, %v517_v8 }
  0x76   : > { %1600 = vmatmul.msk.f32.gmra.mxu0 %vm526_vm0, %v518_v9 }
  0x7e   : > { %1601 = vmatmul.msk.f32.gmra.mxu0 %vm526_vm0, %v519_v10 }
  0xc3   : > { %v568_v15 = vpop.f32.mrf.mxu0 }
  0xc4   : > { %v569_v16 = vadd.f32 %v1755_v14, %v568_v15 }
  0xc6   : > { %vm592_vm2 = vcmp.gt.f32.partialorder %v569_v16, 0.2 }
  0xc7   : > { %v600_v17 = vsel %vm592_vm2, %v569_v16, 0.0  ;;  %vm894_vm2 = vcmask 64512  }
  0xc8   : > { %1602 = vmatmul.msk.f32.vlgmr.msra.gmra.mxu1 %vm612_vm1, %v600_v17  ;;  %v1346_v21 = vrot.slane %v600_v17, 7 }
  0xcb   : > { %v571_v18 = vpop.f32.mrf.mxu0 }
  0xcc   : > { %v572_v19 = vadd.f32 %v1755_v14, %v571_v18 }
  0xce   : > { %vm593_vm3 = vcmp.gt.f32.partialorder %v572_v19, 0.2 }
  0xcf   : > { %v601_v20 = vsel %vm593_vm3, %v572_v19, 0.0 }
  0xd0   : > { %1603 = vmatmul.msk.f32.gmra.mxu1 %vm612_vm1, %v601_v20  ;;  %v1347_v22 = vrot.slane %v601_v20, 6 }
  0xd2   : > { %v1348_v23 = vsel %vm1278_vm4, %v1347_v22, %v1346_v21 }
  0xd3   : > { %v574_v24 = vpop.f32.mrf.mxu0 }
  0xd4   : > { %v575_v25 = vadd.f32 %v1755_v14, %v574_v24 }
  0xd6   : > { %vm594_vm5 = vcmp.gt.f32.partialorder %v575_v25, 0.2 }
  0xd7   : > { %v602_v26 = vsel %vm594_vm5, %v575_v25, 0.0 }
  0xd8   : > { %1604 = vmatmul.msk.f32.gmra.mxu1 %vm612_vm1, %v602_v26  ;;  %v1349_v27 = vrot.slane %v602_v26, 5 }
  0xda   : > { %v1350_v28 = vsel %vm1280_vm6, %v1349_v27, %v1348_v23 }
  0xdb   : > { %v577_v29 = vpop.f32.mrf.mxu0 }
  0xdc   : > { %v578_v30 = vadd.f32 %v1755_v14, %v577_v29 }
  0xde   : > { %vm595_vm7 = vcmp.gt.f32.partialorder %v578_v30, 0.2 }
  0xdf   : > { %v603_v31 = vsel %vm595_vm7, %v578_v30, 0.0 }
  0xe0   : > { %1605 = vmatmul.msk.f32.gmra.mxu1 %vm612_vm1, %v603_v31  ;;  %v1351_v32 = vrot.slane %v603_v31, 4 }
  0xe2   : > { %v1352_v33 = vsel %vm1282_vm8, %v1351_v32, %v1350_v28 }
  0xe3   : > { %v580_v34 = vpop.f32.mrf.mxu0 }
  0xe4   : > { %v581_v35 = vadd.f32 %v1755_v14, %v580_v34 }
  0xe6   : > { %vm596_vm9 = vcmp.gt.f32.partialorder %v581_v35, 0.2 }
  0xe7   : > { %v604_v36 = vsel %vm596_vm9, %v581_v35, 0.0 }
  0xe8   : > { %1606 = vmatmul.msk.f32.gmra.mxu1 %vm612_vm1, %v604_v36  ;;  %v1353_v37 = vrot.slane %v604_v36, 3 }
  0xea   : > { %v1354_v38 = vsel %vm1284_vm10, %v1353_v37, %v1352_v33 }
  0xeb   : > { %v583_v39 = vpop.f32.mrf.mxu0 }
  0xec   : > { %v584_v40 = vadd.f32 %v1755_v14, %v583_v39 }
  0xee   : > { %vm597_vm11 = vcmp.gt.f32.partialorder %v584_v40, 0.2 }
  0xef   : > { %v605_v41 = vsel %vm597_vm11, %v584_v40, 0.0 }
  0xf0   : > { %1607 = vmatmul.msk.f32.gmra.mxu1 %vm612_vm1, %v605_v41  ;;  %v1355_v42 = vrot.slane %v605_v41, 2 }
  0xf2   : > { %v1356_v43 = vsel %vm1286_vm12, %v1355_v42, %v1354_v38 }
  0xf3   : > { %v586_v44 = vpop.f32.mrf.mxu0 }
  0xf4   : > { %v587_v45 = vadd.f32 %v1755_v14, %v586_v44 }
  0xf6   : > { %vm598_vm13 = vcmp.gt.f32.partialorder %v587_v45, 0.2 }
  0xf7   : > { %v606_v46 = vsel %vm598_vm13, %v587_v45, 0.0 }
  0xf8   : > { %1608 = vmatmul.msk.f32.gmra.mxu1 %vm612_vm1, %v606_v46  ;;  %v1357_v47 = vrot.slane %v606_v46, 1 }
  0xfa   : > { %v1358_v48 = vsel %vm1288_vm14, %v1357_v47, %v1356_v43 }
  0xfb   : > { %v589_v49 = vpop.f32.mrf.mxu0 }
  0xfc   : > { %v590_v50 = vadd.f32 %v1755_v14, %v589_v49 }
  0xfe   : > { %vm599_vm0 = vcmp.gt.f32.partialorder %v590_v50, 0.2 }
  0xff   : > { %v607_v51 = vsel %vm599_vm0, %v590_v50, 0.0 }
 0x100   : > { %1609 = vmatmul.msk.f32.gmra.mxu1 %vm612_vm1, %v607_v51  ;;  %v2278_v52 = vsel %vm1290_vm15, %v607_v51, %v1358_v48 }
 0x145   : > { %v2280_v53 = vpop.f32.mrf.mxu1 }
 0x146   : > { %679 = vrot.lane.b32.xlu0 %v2280_v53, %s2027_s20 }
 0x14d   : > { %v2283_v54 = vpop.f32.mrf.mxu1 }
 0x14e   : > { %706 = vrot.lane.b32.xlu0 %v2283_v54, %s2027_s20  ;;  %v1735_v21 = vpack.i.bf16 %v2283_v54, %v2280_v53 }
 0x155   : > { %v2286_v55 = vpop.f32.mrf.mxu1 }
 0x156   : > { %733 = vrot.lane.b32.xlu1 %v2286_v55, %s2027_s20 }
 0x15d   : > { %v2289_v56 = vpop.f32.mrf.mxu1 }
 0x15e   : > { %760 = vrot.lane.b32.xlu1 %v2289_v56, %s2027_s20 }
 0x165   : > { %v2292_v57 = vpop.f32.mrf.mxu1 }
 0x166   : > { %787 = vrot.lane.b32.xlu2 %v2292_v57, %s2027_s20 }
 0x16d   : > { %v2295_v58 = vpop.f32.mrf.mxu1 }
 0x16e   : > { %814 = vrot.lane.b32.xlu2 %v2295_v58, %s2027_s20  ;;  %v1745_v50 = vpack.i.bf16 %v2295_v58, %v2292_v57 }
 0x175   : > { %v2298_v59 = vpop.f32.mrf.mxu1 }
 0x176   : > { %841 = vrot.lane.b32.xlu0 %v2298_v59, %s2027_s20 }
 0x17d   : > { %v2301_v60 = vpop.f32.mrf.mxu1 }
 0x17e   : > { %868 = vrot.lane.b32.xlu1 %v2301_v60, %s2027_s20  ;;  %s1965_s20 = scalar_lea.hbm %s2482_s12, 16 }
 0x17f   : > { %p1967_p2 = scmp.lt.s32.totalorder %s1965_s20, %s1961_s26 }
 0x181   : > { %p1968_p9 = por %p1967_p2, %p1966_p11 }
 0x183   : > { %p1969_p10 = pnand %p1968_p9, %p1964_p8 }
 0x1b8   : > { %v680_v61 = vpop.permute.xlu0 %679 }
 0x1b9   : > { %1610 = vmatpush.xpose.msk.msra.mxu2 %vm612_vm1, %v680_v61 }
 0x1bc   : > { %1611 = vmatmul.msk.f32.vlgmr.msra.gmra.mxu2 %vm612_vm1, %v2280_v53 }
 0x1c0   : > { %v707_v62 = vpop.permute.xlu0 %706  ;;  %v788_v63 = vpop.permute.xlu2 %787 }
 0x1c1   : > { %1612 = vmatpush.xpose.msk.msra.mxu3 %vm612_vm1, %v707_v62 }
 0x1c4   : > { %1613 = vmatmul.msk.f32.vlgmr.msra.gmra.mxu3 %vm612_vm1, %v2283_v54 }
 0x1c8   : > { %v734_v0 = vpop.permute.xlu1 %733  ;;  %v815_v2 = vpop.permute.xlu2 %814 }
 0x1c9   : > { %1614 = vmatpush.xpose.msk.msrb.mxu2 %vm612_vm1, %v734_v0 }
 0x1cc   : > { %1615 = vmatmul.msk.f32.vlgmr.msrb.gmra.mxu2 %vm612_vm1, %v2286_v55 }
 0x1cd   : > { %1618 = vmatpush.xpose.msk.msra.mxu2 %vm612_vm1, %v788_v63 }
 0x1d0   : > { %v761_v1 = vpop.permute.xlu1 %760 }
 0x1d1   : > { %1616 = vmatpush.xpose.msk.msrb.mxu3 %vm612_vm1, %v761_v1 }
 0x1d4   : > { %1617 = vmatmul.msk.f32.vlgmr.msrb.gmra.mxu3 %vm612_vm1, %v2289_v56  ;;  %1619 = vmatmul.msk.f32.vlgmr.msra.gmra.mxu2 %vm612_vm1, %v2292_v57 }
 0x1d5   : > { %1620 = vmatpush.xpose.msk.msra.mxu3 %vm612_vm1, %v815_v2 }
 0x1dc   : > { %1621 = vmatmul.msk.f32.vlgmr.msra.gmra.mxu3 %vm612_vm1, %v2295_v58 }
 0x1e8   : > { %v842_v3 = vpop.permute.xlu0 %841 }
 0x1e9   : > { %1622 = vmatpush.xpose.msk.msrb.mxu2 %vm612_vm1, %v842_v3  ;;  %v1740_v3 = vpack.i.bf16 %v2289_v56, %v2286_v55 }
 0x1ec   : > { %1623 = vmatmul.msk.f32.vlgmr.msrb.gmra.mxu2 %vm612_vm1, %v2298_v59 }
 0x1f0   : > { %v869_v4 = vpop.permute.xlu1 %868 }
 0x1f1   : > { %1624 = vmatpush.xpose.msk.msrb.mxu3 %vm612_vm1, %v869_v4 }
 0x1f4   : > { %1625 = vmatmul.msk.f32.vlgmr.msrb.gmra.mxu3 %vm612_vm1, %v2301_v60 }
 0x23f   : > { %v702_v5 = vpop.f32.mrf.mxu2 }
 0x240   : > { %v895_v6 = vsel %vm894_vm2, %v702_v5, -inf }
 0x241   : > { %896 = vmax.xlane.f32.xlu2 %v895_v6 }
 0x247   : > { %v729_v7 = vpop.f32.mrf.mxu3 }
 0x248   : > { %v898_v8 = vsel %vm894_vm2, %v729_v7, -inf }
 0x249   : > { %899 = vmax.xlane.f32.xlu0 %v898_v8  ;;  %v1750_v8 = vpack.i.bf16 %v2301_v60, %v2298_v59 }
 0x24f   : > { %v756_v9 = vpop.f32.mrf.mxu2 }
 0x250   : > { %v901_v10 = vsel %vm894_vm2, %v756_v9, -inf }
 0x251   : > { %902 = vmax.xlane.f32.xlu1 %v901_v10 }
 0x257   : > { %v783_v11 = vpop.f32.mrf.mxu3  ;;  %v810_v13 = vpop.f32.mrf.mxu2 }
 0x258   : > { %v904_v12 = vsel %vm894_vm2, %v783_v11, -inf  ;;  %v907_v15 = vsel %vm894_vm2, %v810_v13, -inf }
 0x259   : > { %905 = vmax.xlane.f32.xlu2 %v904_v12 }
 0x25f   : > { %v837_v14 = vpop.f32.mrf.mxu3 }
 0x260   : > { %v910_v16 = vsel %vm894_vm2, %v837_v14, -inf }
 0x261   : > { %908 = vmax.xlane.f32.xlu2 %v907_v15  ;;  %911 = vmax.xlane.f32.xlu0 %v910_v16 }
 0x26f   : > { %v864_v17 = vpop.f32.mrf.mxu2 }
 0x270   : > { %v913_v18 = vsel %vm894_vm2, %v864_v17, -inf }
 0x271   : > { %914 = vmax.xlane.f32.xlu1 %v913_v18 }
 0x277   : > { %v891_v19 = vpop.f32.mrf.mxu3 }
 0x278   : > { %v916_v20 = vsel %vm894_vm2, %v891_v19, -inf }
 0x279   : > { %917 = vmax.xlane.f32.xlu2 %v916_v20 }
 0x28a   : > { %1736 = vrot.lane.b32.xlu1 %v1735_v21, %s2028_s6 }
 0x2b4   : > { %v897_v22 = vpop.xlane.xlu2 %896 }
 0x2b5   : > { %v919_v23 = vsub.f32 %v702_v5, %v897_v22 }
 0x2b7   : > { %v927_v24 = vmul.f32 1.442695, %v919_v23 }
 0x2b9   : > { %1759 = vpow2.f32 %v927_v24 }
 0x2bc   : > { %v900_v25 = vpop.xlane.xlu0 %899 }
 0x2bd   : > { %v920_v26 = vsub.f32 %v729_v7, %v900_v25 }
 0x2bf   : > { %v2339_v27 = vpop.eup %1759  ;;  %v929_v28 = vmul.f32 1.442695, %v920_v26 }
 0x2c0   : > { %v943_v29 = vsel %vm894_vm2, %v2339_v27, 0.0 }
 0x2c1   : > { %1761 = vpow2.f32 %v929_v28  ;;  %944 = vadd.xlane.f32.xlu0 %v943_v29 }
 0x2c4   : > { %v903_v30 = vpop.xlane.xlu1 %902 }
 0x2c5   : > { %v921_v31 = vsub.f32 %v756_v9, %v903_v30 }
 0x2c7   : > { %v1762_v32 = vpop.eup %1761  ;;  %v931_v33 = vmul.f32 1.442695, %v921_v31 }
 0x2c8   : > { %v946_v34 = vsel %vm894_vm2, %v1762_v32, 0.0 }
 0x2c9   : > { %1763 = vpow2.f32 %v931_v33  ;;  %947 = vadd.xlane.f32.xlu1 %v946_v34 }
 0x2cc   : > { %v906_v35 = vpop.xlane.xlu2 %905 }
 0x2cd   : > { %v922_v36 = vsub.f32 %v783_v11, %v906_v35 }
 0x2cf   : > { %v2344_v37 = vpop.eup %1763  ;;  %v933_v38 = vmul.f32 1.442695, %v922_v36 }
 0x2d0   : > { %v949_v39 = vsel %vm894_vm2, %v2344_v37, 0.0 }
 0x2d1   : > { %1765 = vpow2.f32 %v933_v38  ;;  %950 = vadd.xlane.f32.xlu2 %v949_v39  ;;  %v1318_v38 = vld [vmem:[#allocation8 + $0x18] sm:$0xff]  ;;  %v1317_v39 = vld [vmem:[#allocation8 + $0x10] sm:$0xff] }
 0x2d4   : > { %v909_v40 = vpop.xlane.xlu2 %908  ;;  %v912_v41 = vpop.xlane.xlu0 %911 }
 0x2d5   : > { %v923_v42 = vsub.f32 %v810_v13, %v909_v40  ;;  %v924_v43 = vsub.f32 %v837_v14, %v912_v41  ;;  %v1316_v40 = vld [vmem:[#allocation8 + $0x8] sm:$0xff]  ;;  %v1315_v41 = vld [vmem:[#allocation8] sm:$0xff] }
 0x2d7   : > { %v2348_v44 = vpop.eup %1765  ;;  %v935_v45 = vmul.f32 1.442695, %v923_v42  ;;  %v937_v46 = vmul.f32 1.442695, %v924_v43  ;;  %v1265_v42 = vld [vmem:[#allocation7 + $0x18] sm:$0xff]  ;;  %v1264_v43 = vld [vmem:[#allocation7 + $0x10] sm:$0xff] }
 0x2d8   : > { %v952_v47 = vsel %vm894_vm2, %v2348_v44, 0.0  ;;  %1306 = vmatpush.msrb.mxu0 %v1265_v42 }
 0x2d9   : > { %1767 = vpow2.f32 %v935_v45  ;;  %953 = vadd.xlane.f32.xlu0 %v952_v47 }
 0x2da   : > { %1769 = vpow2.f32 %v937_v46  ;;  %1307 = vmatpush.msrb.mxu0 %v1264_v43 }
 0x2df   : > { %v2352_v48 = vpop.eup %1767 }
 0x2e0   : > { %v2354_v49 = vpop.eup %1769  ;;  %v955_v51 = vsel %vm894_vm2, %v2352_v48, 0.0 }
 0x2e1   : > { %v958_v53 = vsel %vm894_vm2, %v2354_v49, 0.0  ;;  %956 = vadd.xlane.f32.xlu2 %v955_v51 }
 0x2e2   : > { %959 = vadd.xlane.f32.xlu0 %v958_v53  ;;  %1746 = vrot.lane.b32.xlu1 %v1745_v50, %s2028_s6  ;;  %v2029_v50 = vmov 8.0  }
 0x2e4   : > { %v915_v54 = vpop.xlane.xlu1 %914 }
 0x2e5   : > { %v925_v61 = vsub.f32 %v864_v17, %v915_v54 }
 0x2e7   : > { %v939_v62 = vmul.f32 1.442695, %v925_v61 }
 0x2e9   : > { %1771 = vpow2.f32 %v939_v62 }
 0x2ec   : > { %v918_v63 = vpop.xlane.xlu2 %917 }
 0x2ed   : > { %v926_v0 = vsub.f32 %v891_v19, %v918_v63 }
 0x2ef   : > { %v2363_v1 = vpop.eup %1771  ;;  %v941_v2 = vmul.f32 1.442695, %v926_v0 }
 0x2f0   : > { %v961_v57 = vsel %vm894_vm2, %v2363_v1, 0.0 }
 0x2f1   : > { %1773 = vpow2.f32 %v941_v2  ;;  %962 = vadd.xlane.f32.xlu0 %v961_v57  ;;  %v1262_v2 = vld [vmem:[#allocation7] sm:$0xff] }
 0x2f7   : > { %v1774_v58 = vpop.eup %1773 }
 0x2f8   : > { %v964_v4 = vsel %vm894_vm2, %v1774_v58, 0.0 }
 0x2f9   : > { %1741 = vrot.lane.b32.xlu2 %v1740_v3, %s2028_s6  ;;  %965 = vadd.xlane.f32.xlu0 %v964_v4 }
 0x2fc   : > { %v1737_v5 = vpop.permute.xlu1 %1736 }
 0x2fd   : > { %v1739_v6 = vunpack.i.h.bf16 %v1737_v5  ;;  %v1738_v7 = vunpack.i.l.bf16 %v1737_v5 }
 0x2ff   : > { %1004 = vmatpush.msra.mxu2 %v1738_v7  ;;  %1030 = vmatpush.msra.mxu3 %v1739_v6 }
 0x30d   : > { %1751 = vrot.lane.b32.xlu0 %v1750_v8, %s2028_s6 }
 0x334   : > { %v945_v9 = vpop.xlane.xlu0 %944 }
 0x335   : > { %1775 = vrcp.f32 %v945_v9 }
 0x33b   : > { %v1776_v10 = vpop.eup %1775 }
 0x33c   : > { %v975_v55 = vmul.f32 %v1776_v10, %v2339_v27  ;;  %v948_v56 = vpop.xlane.xlu1 %947 }
 0x33d   : > { %1777 = vrcp.f32 %v948_v56 }
 0x33e   : > { %1626 = vmatmul.msk.f32.vlgmr.msra.gmra.mxu2 %vm894_vm2, %v975_v55 }
 0x343   : > { %v1778_v11 = vpop.eup %1777 }
 0x344   : > { %v976_v12 = vmul.f32 %v1778_v11, %v1762_v32  ;;  %v951_v13 = vpop.xlane.xlu2 %950 }
 0x345   : > { %1779 = vrcp.f32 %v951_v13 }
 0x346   : > { %1627 = vmatmul.msk.f32.vlgmr.msra.gmra.mxu3 %vm894_vm2, %v976_v12 }
 0x34b   : > { %v1780_v59 = vpop.eup %1779 }
 0x34c   : > { %v954_v14 = vpop.xlane.xlu0 %953  ;;  %v977_v21 = vmul.f32 %v1780_v59, %v2344_v37 }
 0x34d   : > { %1781 = vrcp.f32 %v954_v14 }
 0x353   : > { %v1782_v16 = vpop.eup %1781 }
 0x354   : > { %v957_v15 = vpop.xlane.xlu2 %956  ;;  %v1747_v17 = vpop.permute.xlu1 %1746  ;;  %v978_v22 = vmul.f32 %v1782_v16, %v2348_v44  ;;  %v1263_v44 = vld [vmem:[#allocation7 + $0x8] sm:$0xff] }
 0x355   : > { %v960_v60 = vpop.xlane.xlu0 %959  ;;  %1783 = vrcp.f32 %v957_v15  ;;  %v1749_v23 = vunpack.i.h.bf16 %v1747_v17  ;;  %v1748_v24 = vunpack.i.l.bf16 %v1747_v17  ;;  %1308 = vmatpush.msrb.mxu0 %v1263_v44 }
 0x356   : > { %1785 = vrcp.f32 %v960_v60 }
 0x357   : > { %1309 = vmatpush.msrb.mxu0 %v1262_v2 }
 0x35b   : > { %v1784_v25 = vpop.eup %1783 }
 0x35c   : > { %v1742_v18 = vpop.permute.xlu2 %1741  ;;  %v1786_v26 = vpop.eup %1785  ;;  %v979_v28 = vmul.f32 %v1784_v25, %v2352_v48 }
 0x35d   : > { %v1744_v19 = vunpack.i.h.bf16 %v1742_v18  ;;  %v1743_v20 = vunpack.i.l.bf16 %v1742_v18  ;;  %v980_v27 = vmul.f32 %v1786_v26, %v2354_v49 }
 0x35f   : > { %1056 = vmatpush.msrb.mxu2 %v1743_v20  ;;  %1082 = vmatpush.msrb.mxu3 %v1744_v19 }
 0x360   : > { %1628 = vmatmul.msk.f32.vlgmr.msrb.gmra.mxu2 %vm894_vm2, %v977_v21  ;;  %1629 = vmatmul.msk.f32.vlgmr.msrb.gmra.mxu3 %vm894_vm2, %v978_v22 }
 0x361   : > { %1108 = vmatpush.msra.mxu2 %v1748_v24  ;;  %1134 = vmatpush.msra.mxu3 %v1749_v23 }
 0x364   : > { %v963_v29 = vpop.xlane.xlu0 %962 }
 0x365   : > { %1787 = vrcp.f32 %v963_v29 }
 0x368   : > { %1630 = vmatmul.msk.f32.vlgmr.msra.gmra.mxu2 %vm894_vm2, %v979_v28  ;;  %1631 = vmatmul.msk.f32.vlgmr.msra.gmra.mxu3 %vm894_vm2, %v980_v27 }
 0x36b   : > { %v1788_v31 = vpop.eup %1787 }
 0x36c   : > { %v966_v30 = vpop.xlane.xlu0 %965  ;;  %v981_v36 = vmul.f32 %v1788_v31, %v2363_v1 }
 0x36d   : > { %1789 = vrcp.f32 %v966_v30 }
 0x36e   : > { %1791 = vrcp.f32 %v2029_v50 }
 0x373   : > { %v1790_v32 = vpop.eup %1789 }
 0x374   : > { %v982_v37 = vmul.f32 %v1790_v32, %v1774_v58  ;;  %v1792_v57 = vpop.eup %1791 }
 0x375   : > { %v1248_v8 = vmul.f32 8.0, %v1792_v57  ;;  %vm1252_vm3 = vweird.f32 %v1792_v57 }
 0x377   : > { %v1249_v13 = vsub.f32 1.0, %v1248_v8  ;;  %v1322_v8 = vld [vmem:[#allocation10 + $0x18] sm:$0xff] }
 0x379   : > { %v1250_v18 = vmul.f32 %v1792_v57, %v1249_v13  ;;  %v1388_v13 = vld [vmem:[%s2479_s9] sm:$0xff] }
 0x37b   : > { %v1251_v25 = vadd.f32 %v1792_v57, %v1250_v18 }
 0x37f   : > { %v1752_v33 = vpop.permute.xlu0 %1751 }
 0x380   : > { %v1754_v34 = vunpack.i.h.bf16 %v1752_v33  ;;  %v1753_v35 = vunpack.i.l.bf16 %v1752_v33 }
 0x382   : > { %1160 = vmatpush.msrb.mxu2 %v1753_v35  ;;  %1186 = vmatpush.msrb.mxu3 %v1754_v34 }
 0x383   : > { %1632 = vmatmul.msk.f32.vlgmr.msrb.gmra.mxu2 %vm894_vm2, %v981_v36  ;;  %1633 = vmatmul.msk.f32.vlgmr.msrb.gmra.mxu3 %vm894_vm2, %v982_v37  ;;  %v1253_v36 = vsel %vm1252_vm3, %v1792_v57, %v1251_v25 }
 0x384   : > { %1374 = vmatpush.msra.mxu3 %v1318_v38  ;;  %1338 = vmatpush.msra.mxu2 %v1322_v8 }
 0x386   : > { %1375 = vmatpush.msra.mxu3 %v1317_v39 }
 0x388   : > { %1376 = vmatpush.msra.mxu3 %v1316_v40 }
 0x38a   : > { %1377 = vmatpush.msra.mxu3 %v1315_v41 }
 0x38b   : > { %1636 = vmatmul.msk.f32.vlgmr.msra.gmra.mxu3 %vm612_vm1, %v2278_v52 }
 0x3c1   : > { %v1006_v45 = vpop.f32.mrf.mxu2 }
 0x3c2   : > { %v1191_v53 = vsel %vm612_vm1, %v1006_v45, 0.0 }
 0x3c3   : > { %v1192_v63 = vrot.slane %v1191_v53, 4 }
 0x3c5   : > { %v1193_v7 = vadd.f32 %v1192_v63, %v1191_v53 }
 0x3c7   : > { %v1194_v12 = vrot.slane %v1193_v7, 2 }
 0x3c9   : > { %v1032_v46 = vpop.f32.mrf.mxu3  ;;  %v1195_v17 = vadd.f32 %v1194_v12, %v1193_v7  ;;  %v1389_v12 = vld [vmem:[%s2479_s9 + $0x8] sm:$0xff] }
 0x3ca   : > { %v1198_v49 = vsel %vm612_vm1, %v1032_v46, 0.0 }
 0x3cb   : > { %v1199_v52 = vrot.slane %v1198_v49, 4  ;;  %v1196_v24 = vrot.slane %v1195_v17, 1 }
 0x3cd   : > { %v1200_v58 = vadd.f32 %v1199_v52, %v1198_v49  ;;  %v1197_v33 = vadd.f32 %v1196_v24, %v1195_v17 }
 0x3cf   : > { %v1201_v9 = vrot.slane %v1200_v58, 2  ;;  %v1254_v46 = vmul.f32 %v1253_v36, %v1197_v33 }
 0x3d1   : > { %v1202_v14 = vadd.f32 %v1201_v9, %v1200_v58  ;;  %v1321_v9 = vld [vmem:[#allocation10 + $0x10] sm:$0xff] }
 0x3d2   : > { %1339 = vmatpush.msra.mxu2 %v1321_v9 }
 0x3d3   : > { %v1203_v19 = vrot.slane %v1202_v14, 1 }
 0x3d5   : > { %v1204_v26 = vadd.f32 %v1203_v19, %v1202_v14  ;;  %v1756_v14 = vld [vmem:[%s2475_s5] ss:$0 sm:$0xff] }
 0x3d7   : > { %v1255_v39 = vmul.f32 %v1253_v36, %v1204_v26 }
 0x3d9   : > { %v1279_v49 = vsel %vm1278_vm4, %v1255_v39, %v1254_v46 }
 0x3e3   : > { %v1058_v47 = vpop.f32.mrf.mxu2  ;;  %v1084_v48 = vpop.f32.mrf.mxu3 }
 0x3e4   : > { %v1205_v51 = vsel %vm612_vm1, %v1058_v47, 0.0  ;;  %v1212_v62 = vsel %vm612_vm1, %v1084_v48, 0.0 }
 0x3e5   : > { %v1206_v61 = vrot.slane %v1205_v51, 4  ;;  %v1213_v3 = vrot.slane %v1212_v62, 4 }
 0x3e7   : > { %v1207_v4 = vadd.f32 %v1206_v61, %v1205_v51  ;;  %v1214_v10 = vadd.f32 %v1213_v3, %v1212_v62 }
 0x3e9   : > { %v1208_v56 = vrot.slane %v1207_v4, 2  ;;  %v1215_v15 = vrot.slane %v1214_v10, 2 }
 0x3eb   : > { %v1110_v54 = vpop.f32.mrf.mxu2  ;;  %v1136_v1 = vpop.f32.mrf.mxu3  ;;  %v1209_v60 = vadd.f32 %v1208_v56, %v1207_v4  ;;  %v1216_v20 = vadd.f32 %v1215_v15, %v1214_v10  ;;  %v1320_v10 = vld [vmem:[#allocation10 + $0x8] sm:$0xff] }
 0x3ec   : > { %v1219_v0 = vsel %vm612_vm1, %v1110_v54, 0.0  ;;  %v1226_v6 = vsel %vm612_vm1, %v1136_v1, 0.0  ;;  %1340 = vmatpush.msra.mxu2 %v1320_v10  ;;  %v1391_v56 = vld [vmem:[%s2479_s9 + $0x18] sm:$0xff] }
 0x3ed   : > { %v1220_v5 = vrot.slane %v1219_v0, 4  ;;  %v1227_v55 = vrot.slane %v1226_v6, 4  ;;  %v1210_v22 = vrot.slane %v1209_v60, 1  ;;  %v1217_v27 = vrot.slane %v1216_v20, 1  ;;  %1411 = vmatpush.msrb.mxu1 %v1391_v56 }
 0x3ef   : > { %v1221_v11 = vadd.f32 %v1220_v5, %v1219_v0  ;;  %v1228_v59 = vadd.f32 %v1227_v55, %v1226_v6  ;;  %v1211_v29 = vadd.f32 %v1210_v22, %v1209_v60  ;;  %v1218_v40 = vadd.f32 %v1217_v27, %v1216_v20  ;;  %v1319_v55 = vld [vmem:[#allocation10] sm:$0xff] }
 0x3f0   : > { %1341 = vmatpush.msra.mxu2 %v1319_v55 }
 0x3f1   : > { %v1222_v16 = vrot.slane %v1221_v11, 2  ;;  %v1229_v21 = vrot.slane %v1228_v59, 2  ;;  %v1256_v42 = vmul.f32 %v1253_v36, %v1211_v29  ;;  %v1257_v50 = vmul.f32 %v1253_v36, %v1218_v40 }
 0x3f3   : > { %v1223_v23 = vadd.f32 %v1222_v16, %v1221_v11  ;;  %v1230_v28 = vadd.f32 %v1229_v21, %v1228_v59  ;;  %v1281_v53 = vsel %vm1280_vm6, %v1256_v42, %v1279_v49  ;;  %v1390_v11 = vld [vmem:[%s2479_s9 + $0x10] sm:$0xff]  ;;  %v1757_v16 = vld [vmem:[%s2478_s8] ss:$0 sm:$0xff] }
 0x3f4   : > { %v1283_v0 = vsel %vm1282_vm8, %v1257_v50, %v1281_v53  ;;  %1412 = vmatpush.msrb.mxu1 %v1390_v11 }
 0x3f5   : > { %v1224_v30 = vrot.slane %v1223_v23, 1  ;;  %v1231_v41 = vrot.slane %v1230_v28, 1 }
 0x3f6   : > { %1413 = vmatpush.msrb.mxu1 %v1389_v12 }
 0x3f7   : > { %v1225_v43 = vadd.f32 %v1224_v30, %v1223_v23  ;;  %v1232_v51 = vadd.f32 %v1231_v41, %v1230_v28 }
 0x3f8   : > { %1414 = vmatpush.msrb.mxu1 %v1388_v13 }
 0x3f9   : > { %v1258_v54 = vmul.f32 %v1253_v36, %v1225_v43  ;;  %v1259_v1 = vmul.f32 %v1253_v36, %v1232_v51 }
 0x3fb   : > { %v1285_v58 = vsel %vm1284_vm10, %v1258_v54, %v1283_v0 }
 0x3fc   : > { %v1287_v5 = vsel %vm1286_vm12, %v1259_v1, %v1285_v58 }
 0x406   : > { %v1162_v31 = vpop.f32.mrf.mxu2  ;;  %v1188_v32 = vpop.f32.mrf.mxu3 }
 0x407   : > { %v1233_v34 = vsel %vm612_vm1, %v1162_v31, 0.0  ;;  %v1240_v35 = vsel %vm612_vm1, %v1188_v32, 0.0 }
 0x408   : > { %v1234_v37 = vrot.slane %v1233_v34, 4  ;;  %v1241_v38 = vrot.slane %v1240_v35, 4 }
 0x40a   : > { %v1235_v44 = vadd.f32 %v1234_v37, %v1233_v34  ;;  %v1242_v45 = vadd.f32 %v1241_v38, %v1240_v35 }
 0x40c   : > { %v1236_v47 = vrot.slane %v1235_v44, 2  ;;  %v1243_v48 = vrot.slane %v1242_v45, 2 }
 0x40e   : > { %v1237_v52 = vadd.f32 %v1236_v47, %v1235_v44  ;;  %v1244_v61 = vadd.f32 %v1243_v48, %v1242_v45  ;;  %v1379_v17 = vpop.f32.mrf.mxu3 }
 0x410   : > { %v1238_v62 = vrot.slane %v1237_v52, 1  ;;  %v1245_v63 = vrot.slane %v1244_v61, 1 }
 0x412   : > { %v1239_v2 = vadd.f32 %v1238_v62, %v1237_v52  ;;  %v1246_v57 = vadd.f32 %v1245_v63, %v1244_v61 }
 0x414   : > { %v1260_v3 = vmul.f32 %v1253_v36, %v1239_v2  ;;  %v1261_v4 = vmul.f32 %v1253_v36, %v1246_v57 }
 0x416   : > { %v1289_v6 = vsel %vm1288_vm14, %v1260_v3, %v1287_v5 }
 0x417   : > { %v1291_v7 = vsel %vm1290_vm15, %v1261_v4, %v1289_v6 }
 0x418   : > { %1634 = vmatmul.msk.f32.vlgmr.msrb.gmra.mxu0 %vm612_vm1, %v1291_v7 }
 0x495   : > { %v1311_v15 = vpop.f32.mrf.mxu0 }
 0x496   : > { %v1312_v59 = vadd.f32 %v1756_v14, %v1311_v15 }
 0x498   : > { %1793 = vtanh.f32 %v1312_v59 }
 0x49e   : > { %v1794_v60 = vpop.eup %1793 }
 0x49f   : > { %1635 = vmatmul.msk.f32.vlgmr.msra.gmra.mxu2 %vm612_vm1, %v1794_v60  ;;  %1420 = vst.msk [vmem:[%s506_s17] sm:$0xff] %vm612_vm1, %v1794_v60 }
 0x522   : > { %v1343_v18 = vpop.f32.mrf.mxu2 }
 0x523   : > { %v1380_v19 = vadd.f32 %v1379_v17, %v1343_v18 }
 0x525   : > { %v1386_v20 = vadd.f32 %v1757_v16, %v1380_v19 }
 0x527   : > { %v1387_v21 = vmax.f32 %v1386_v20, 0.0 }
 0x529   : > { %1637 = vmatmul.msk.f32.vlgmr.msrb.gmra.mxu1 %vm612_vm1, %v1387_v21 }
 0x52a   : > { %1972 = shalt.err (!%p1969_p10)
}
 0x52b   : > { %1661 = dma.vmem_to_hbm [thread:$0]  (%p2191_p3), %s1442_s14, 128, %s1444_s29, %s1426_s13   ;;  %v1758_v22 = vld [vmem:[%s2480_s10] ss:$0 sm:$0xff] }
 0x52c   : > { %p508_p12 = scmp.lt.s32.totalorder %s2116_s25, 1 }
 0x52e   : > { %s2513_s25 = smov (!%p508_p12, %s2116_s25), 1 }
 0x52f   : > { %s1593_s18 = sshll.u32 %s2513_s25, 3 }
 0x530   : > { %s511_s15 = scalar_lea.vmem %s2481_s11, %s1593_s18 }
 0x5a6   : > { %v1416_v23 = vpop.f32.mrf.mxu1 }
 0x5a7   : > { %v1417_v24 = vadd.f32 %v1758_v22, %v1416_v23 }
 0x5a9   : > { %1419 = vst.msk [vmem:[%s511_s15] sm:$0xff] %vm894_vm2, %v1417_v24 }
 0x5aa PF: > { %s2505_s21 = sld [smem:[#allocation16_spill]]  ;;  %p2507_p3 = scmp.ge.s32.totalorder %s2019_s24, 2 }
 0x5ac   : > { %p1681_p13 = pnand %p2507_p3, %p2130_p6 }
 0x5ae   : > { %p1682_p0 = pneg %p1681_p13 }
 0x5b0   : > { %s1462_s14 = sand.u32 1, %s2505_s21  }
 0x5b1   : > { %s1463_s25 = scalar_lea.sflag [#allocation4], %s1462_s14 }
 0x5b2   : > { %2002 = dma.done.wait (%p1682_p0), %s1463_s25, 128  }
 0x5b3   : > { %2004 = vsyncadd (%p1682_p0), %s1463_s25, 4294967168  ;;  %p28_p5 = scmp.ge.s32.totalorder %s2181_s30, 4   ;;  %s2508_s21 = smov %s2011_s22 }
 0x5b4   : > { %s2509_s22 = smov %s2015_s23  ;;  %s2510_s23 = smov %s2197_s16 }
 0x5b5   : > { %s2511_s24 = smov %s2181_s30  ;;  %30 = sbr.rel (!%p28_p5) target bundleno = 12 (0xc), region = 137 }
 0x5ba   :  { %1469 = vsyncpa [#allocation3], 1 }
 0x5bb   :  { %1471 = vsyncpa [#allocation3 + $0x1], 1 }
 0x5bc   :  { %1472 = vsyncpa [#allocation6], 1 }
 0x5bd   :  { %1473 = vsyncpa [#allocation9], 1 }
 0x5be   :  { %1474 = vsyncpa [#allocation4], 1 }
 0x5bf   :  { %1476 = vsyncpa [#allocation4 + $0x1], 1 }

</bundles_post_ra>
